<compile_context>
chip_gen: v6e
topology: v6e:2x2x1
jax: 0.10.0
libtpu: 0.0.40
codegen_flags: <defaults>
</compile_context>

<pallas_src>
import functools

import jax
import jax.numpy as jnp
from jax.experimental import pallas as pl
from jax.experimental.pallas import tpu as pltpu


def _round_up(x, n):
    return ((x + n - 1) // n) * n


def _experts_kernel(x_ref, w1_ref, b1_ref, w2_ref, b2_ref, o_ref):
    # x_ref : (TM, D) token tile; w1/w2: (D, D) resident; b1/b2: (1, D).
    # Native-dtype operands feed the MXU; accumulation is f32.
    h = jnp.dot(x_ref[...], w1_ref[...], preferred_element_type=jnp.float32)
    h = jnp.maximum(h + b1_ref[...].astype(jnp.float32), 0.0)          # bias + ReLU in f32
    # Second matmul input in the weight dtype (bf16 MXU rate when weights are bf16;
    # no-op for f32).
    y = jnp.dot(h.astype(w2_ref.dtype), w2_ref[...],
                preferred_element_type=jnp.float32)
    o_ref[...] = (y + b2_ref[...].astype(jnp.float32)).astype(o_ref.dtype)


def _resident_spec(block_shape, index_map):
    # Constant-index blocks (weights/biases) stay resident across the grid;
    # request single buffering to halve their VMEM footprint. Fall back to the
    # default spec if this JAX version doesn't accept pipeline_mode.
    try:
        return pl.BlockSpec(block_shape, index_map, pipeline_mode=pl.Buffered(1))
    except TypeError:
        return pl.BlockSpec(block_shape, index_map)


def experts_forward(x, w1, b1, w2, b2, *, tm=256):
    """Apply the Experts MLP: relu(x @ w1 + b1) @ w2 + b2.

    x: (..., D) float array. Weights w1, w2: (D, D) stored as (in, out);
    biases b1, b2: (D,). tm is the token row tile (sweepable; multiple of 8).
    """
    orig_shape = x.shape
    d = orig_shape[-1]
    x2d = x.reshape(-1, d)
    m = x2d.shape[0]

    # Row tile: MXU-filling by default, clamped so tiny inputs don't over-pad,
    # always a multiple of 8 (sublane constraint).
    tm = max(8, min(_round_up(tm, 8), _round_up(m, 8)))
    m_pad = _round_up(m, tm)
    if m_pad != m:
        x2d = jnp.pad(x2d, ((0, m_pad - m), (0, 0)))

    b1_2d = b1.reshape(1, d)
    b2_2d = b2.reshape(1, d)

    x_itemsize = jnp.dtype(x.dtype).itemsize
    w_itemsize = jnp.dtype(w1.dtype).itemsize
    weight_bytes = 2 * d * d * w_itemsize + 2 * d * w_itemsize
    io_bytes = 2 * m_pad * d * x_itemsize

    cost = pl.CostEstimate(
        flops=4 * m_pad * d * d + 4 * m_pad * d,
        transcendentals=0,
        bytes_accessed=weight_bytes + io_bytes,
    )

    # VMEM: single-buffered weights/biases + double-buffered x/out tiles, with margin.
    needed = weight_bytes + 2 * 2 * tm * d * max(x_itemsize, 4)
    vmem_limit = int(min(max(2 * needed + (16 << 20), 32 << 20), 128 << 20))

    grid = (m_pad // tm,)
    out = pl.pallas_call(
        _experts_kernel,
        out_shape=jax.ShapeDtypeStruct((m_pad, d), x.dtype),
        grid_spec=pltpu.PrefetchScalarGridSpec(
            num_scalar_prefetch=0,
            grid=grid,
            in_specs=[
                pl.BlockSpec((tm, d), lambda i: (i, 0)),        # x tile (pipelined)
                _resident_spec((d, d), lambda i: (0, 0)),        # w1 (resident)
                _resident_spec((1, d), lambda i: (0, 0)),        # b1
                _resident_spec((d, d), lambda i: (0, 0)),        # w2 (resident)
                _resident_spec((1, d), lambda i: (0, 0)),        # b2
            ],
            out_specs=pl.BlockSpec((tm, d), lambda i: (i, 0)),
        ),
        compiler_params=pltpu.CompilerParams(
            dimension_semantics=("parallel",),
            vmem_limit_bytes=vmem_limit,
        ),
        cost_estimate=cost,
    )(x2d, w1, b1_2d, w2, b2_2d)

    if m_pad != m:
        out = out[:m]
    return out.reshape(orig_shape)


def init_experts_params(key, dim_model, dtype=jnp.float32):
    """Deterministic init mimicking nn.Linear's uniform(-1/sqrt(fan_in), 1/sqrt(fan_in))."""
    k1, k2, k3, k4 = jax.random.split(key, 4)
    bound = 1.0 / (dim_model ** 0.5)
    # Stored as (in, out), i.e. transposed relative to PyTorch's (out, in).
    w1 = jax.random.uniform(k1, (dim_model, dim_model), dtype, -bound, bound)
    b1 = jax.random.uniform(k2, (dim_model,), dtype, -bound, bound)
    w2 = jax.random.uniform(k3, (dim_model, dim_model), dtype, -bound, bound)
    b2 = jax.random.uniform(k4, (dim_model,), dtype, -bound, bound)
    return w1, b1, w2, b2


if __name__ == "__main__":
    key = jax.random.PRNGKey(0)
    batch, seq, dim_model = 2, 8, 32

    kx, kp, kx2 = jax.random.split(key, 3)
    x = jax.random.normal(kx, (batch, seq, dim_model), jnp.float32)
    w1, b1, w2, b2 = init_experts_params(kp, dim_model)

    fwd = jax.jit(functools.partial(experts_forward, tm=256))
    y = fwd(x, w1, b1, w2, b2)
    jax.block_until_ready(y)

    # Reference check in plain JAX (same math as the PyTorch module).
    ref = jnp.maximum(x @ w1 + b1, 0.0) @ w2 + b2
    assert y.shape == x.shape
    assert jnp.allclose(y, ref, atol=1e-5, rtol=1e-5), "mismatch vs reference"

    # Ragged token count (21 tokens) exercising the cdiv + padding path.
    x2 = jax.random.normal(kx2, (3, 7, dim_model), jnp.float32)
    y2 = jax.block_until_ready(experts_forward(x2, w1, b1, w2, b2, tm=256))
    ref2 = jnp.maximum(x2 @ w1 + b1, 0.0) @ w2 + b2
    assert y2.shape == x2.shape
    assert jnp.allclose(y2, ref2, atol=1e-5, rtol=1e-5), "mismatch vs reference (padded)"

    print("KERNEL_OK")
</pallas_src>

<mosaic_0001>
module attributes {stable_mosaic.version = 11 : i64} {
  func.func @_experts_kernel(%arg0: i32, %arg1: memref<16x32xf32, #tpu.memory_space<vmem>>, %arg2: memref<32x32xf32, #tpu.memory_space<vmem>>, %arg3: memref<1x32xf32, #tpu.memory_space<vmem>>, %arg4: memref<32x32xf32, #tpu.memory_space<vmem>>, %arg5: memref<1x32xf32, #tpu.memory_space<vmem>>, %arg6: memref<16x32xf32, #tpu.memory_space<vmem>>) attributes {dimension_semantics = [#tpu.dimension_semantics<parallel>], iteration_bounds = array<i64: 1>, scalar_prefetch = 0 : i64, scratch_operands = 0 : i64, tpu.core_type = #tpu.core_type<tc>, window_params = [{transform_indices = @transform_0, window_bounds = array<i64: 16, 32>}, {pipeline_mode = #tpu.pipeline_mode<synchronous>, transform_indices = @transform_1, window_bounds = array<i64: 32, 32>}, {pipeline_mode = #tpu.pipeline_mode<synchronous>, transform_indices = @transform_2, window_bounds = array<i64: 1, 32>}, {pipeline_mode = #tpu.pipeline_mode<synchronous>, transform_indices = @transform_3, window_bounds = array<i64: 32, 32>}, {pipeline_mode = #tpu.pipeline_mode<synchronous>, transform_indices = @transform_4, window_bounds = array<i64: 1, 32>}, {transform_indices = @transform_5, window_bounds = array<i64: 16, 32>}]} {
    %c0 = arith.constant 0 : index
    %c0_0 = arith.constant 0 : index
    %0 = vector.load %arg1[%c0, %c0_0] : memref<16x32xf32, #tpu.memory_space<vmem>>, vector<16x32xf32>
    %c0_1 = arith.constant 0 : index
    %c0_2 = arith.constant 0 : index
    %1 = vector.load %arg2[%c0_1, %c0_2] : memref<32x32xf32, #tpu.memory_space<vmem>>, vector<32x32xf32>
    %cst = arith.constant dense<0.000000e+00> : vector<16x32xf32>
    %2 = tpu.matmul %0, %1, %cst {dimension_numbers = #tpu.dot_dimension_numbers<[1], [0], [0], [1], [0, 0, 1, 1], [], []>} : vector<16x32xf32>, vector<32x32xf32>, vector<16x32xf32> -> vector<16x32xf32>
    %c0_3 = arith.constant 0 : index
    %c0_4 = arith.constant 0 : index
    %3 = vector.load %arg3[%c0_3, %c0_4] : memref<1x32xf32, #tpu.memory_space<vmem>>, vector<1x32xf32>
    %4 = vector.broadcast %3 : vector<1x32xf32> to vector<16x32xf32>
    %5 = arith.addf %2, %4 : vector<16x32xf32>
    %cst_5 = arith.constant 0.000000e+00 : f32
    %6 = vector.broadcast %cst_5 : f32 to vector<16x32xf32>
    %7 = arith.maximumf %5, %6 : vector<16x32xf32>
    %c0_6 = arith.constant 0 : index
    %c0_7 = arith.constant 0 : index
    %8 = vector.load %arg4[%c0_6, %c0_7] : memref<32x32xf32, #tpu.memory_space<vmem>>, vector<32x32xf32>
    %cst_8 = arith.constant dense<0.000000e+00> : vector<16x32xf32>
    %9 = tpu.matmul %7, %8, %cst_8 {dimension_numbers = #tpu.dot_dimension_numbers<[1], [0], [0], [1], [0, 0, 1, 1], [], []>} : vector<16x32xf32>, vector<32x32xf32>, vector<16x32xf32> -> vector<16x32xf32>
    %c0_9 = arith.constant 0 : index
    %c0_10 = arith.constant 0 : index
    %10 = vector.load %arg5[%c0_9, %c0_10] : memref<1x32xf32, #tpu.memory_space<vmem>>, vector<1x32xf32>
    %11 = vector.broadcast %10 : vector<1x32xf32> to vector<16x32xf32>
    %12 = arith.addf %9, %11 : vector<16x32xf32>
    %c0_11 = arith.constant 0 : index
    %c0_12 = arith.constant 0 : index
    %13 = vector.load %arg6[%c0_11, %c0_12] : memref<16x32xf32, #tpu.memory_space<vmem>>, vector<16x32xf32>
    tpu.vector_store %arg6[%c0_11, %c0_12], %12 {strides = array<i32>} : memref<16x32xf32, #tpu.memory_space<vmem>>, vector<16x32xf32>,
    return
  }
  func.func @transform_0(%arg0: i32) -> (i32, i32) {
    %c0_i32 = arith.constant 0 : i32
    %c0_i32_0 = arith.constant 0 : i32
    return %arg0, %c0_i32 : i32, i32
  }
  func.func @transform_1(%arg0: i32) -> (i32, i32) {
    %c0_i32 = arith.constant 0 : i32
    %c0_i32_0 = arith.constant 0 : i32
    %c0_i32_1 = arith.constant 0 : i32
    return %c0_i32, %c0_i32_0 : i32, i32
  }
  func.func @transform_2(%arg0: i32) -> (i32, i32) {
    %c0_i32 = arith.constant 0 : i32
    %c0_i32_0 = arith.constant 0 : i32
    %c0_i32_1 = arith.constant 0 : i32
    return %c0_i32, %c0_i32_0 : i32, i32
  }
  func.func @transform_3(%arg0: i32) -> (i32, i32) {
    %c0_i32 = arith.constant 0 : i32
    %c0_i32_0 = arith.constant 0 : i32
    %c0_i32_1 = arith.constant 0 : i32
    return %c0_i32, %c0_i32_0 : i32, i32
  }
  func.func @transform_4(%arg0: i32) -> (i32, i32) {
    %c0_i32 = arith.constant 0 : i32
    %c0_i32_0 = arith.constant 0 : i32
    %c0_i32_1 = arith.constant 0 : i32
    return %c0_i32, %c0_i32_0 : i32, i32
  }
  func.func @transform_5(%arg0: i32) -> (i32, i32) {
    %c0_i32 = arith.constant 0 : i32
    %c0_i32_0 = arith.constant 0 : i32
    return %arg0, %c0_i32 : i32, i32
  }
}

</mosaic_0001>

<bundles_post_ra>
// kernel: experts_forward.1
= control target key start
LH: loop header
LB: loop body
LE: loop exit
PB: predicated region body
PF: predicated region fallthrough
CT: control target
= control target key end

     0   :  { %10 = vsyncpa [#allocation3], 0  ;;  %s475_s0 = inlined_call_operand.hbm [shape: f32[16,32], index: 0, kind: input, shape index: {}]   ;;  %s476_s1 = inlined_call_operand.hbm [shape: f32[32,32], index: 1, kind: input, shape index: {}]   ;;  %s477_s2 = inlined_call_operand.vmem [shape: f32[1,32], index: 2, kind: input, shape index: {}]   ;;  %s478_s3 = inlined_call_operand.hbm [shape: f32[32,32], index: 3, kind: input, shape index: {}]   ;;  %s479_s4 = inlined_call_operand.vmem [shape: f32[1,32], index: 4, kind: input, shape index: {}]   ;;  %s480_s5 = inlined_call_operand.hbm [shape: f32[16,32], index: 5, kind: output, shape index: {}]  }
   0x1   :  { %11 = vsyncpa [#allocation6], 0 }
   0x2   :  { %12 = vsyncpa [#allocation4], 0  ;;  %s403_s18 = smov [#allocation5]   ;;  %s404_s20 = smov [#allocation2]  }
   0x3   :  { %s30_s19 = sshll.u32 %s403_s18, 4  ;;  %s18_s21 = sshll.u32 %s404_s20, 4  ;;  %s31_s19 = int_to_ptr.vmem [resolvable:$true] %s30_s19  ;;  %s19_s21 = int_to_ptr.vmem [resolvable:$true] %s18_s21 }
   0x4   :  { %s325_s22 = scalar_lea.vmem %s31_s19, 512  ;;  %p330_p1 = scmp.lt.s32.totalorder %s31_s19, %s31_s19 }
   0x5   :  { %p326_p0 = scmp.ne.s32.totalorder %s31_s19, %s325_s22  ;;  %p331_p2 = scmp.lt.s32.totalorder %s325_s22, %s325_s22 }
   0x7   :  { %p332_p3 = por %p331_p2, %p330_p1 }
   0x9   :  { %p333_p4 = pnand %p332_p3, %p326_p0 }
   0xb   :  { %336 = shalt.err (!%p333_p4)
}
   0xc   :  { %s405_s23 = smov 128   ;;  %s406_s24 = smov 8  }
   0xd   :  { %36 = dma.hbm_to_vmem [thread:$0]  %s476_s1, 512, %s31_s19, [#allocation6], %s405_s23, %s405_s23, %s406_s24  }
   0xe   :  { %s345_s27 = scalar_lea.vmem %s19_s21, 256  ;;  %p350_p6 = scmp.lt.s32.totalorder %s19_s21, %s19_s21 }
   0xf   :  { %p346_p5 = scmp.ne.s32.totalorder %s19_s21, %s345_s27  ;;  %p351_p7 = scmp.lt.s32.totalorder %s345_s27, %s345_s27 }
  0x11   :  { %p352_p8 = por %p351_p7, %p350_p6 }
  0x13   :  { %p353_p9 = pnand %p352_p8, %p346_p5 }
  0x15   :  { %356 = shalt.err (!%p353_p9)
}
  0x16   :  { %24 = dma.hbm_to_vmem [thread:$0]  %s475_s0, 256, %s19_s21, [#allocation3], %s405_s23, %s405_s23, %s406_s24  }
  0x17   :  { %s407_s30 = smov [#allocation7]  }
  0x18   :  { %s44_s6 = sshll.u32 %s407_s30, 4  ;;  %s45_s6 = int_to_ptr.vmem [resolvable:$true] %s44_s6 }
  0x19   :  { %s365_s7 = scalar_lea.vmem %s45_s6, 512  ;;  %p370_p11 = scmp.lt.s32.totalorder %s45_s6, %s45_s6 }
  0x1a   :  { %p366_p10 = scmp.ne.s32.totalorder %s45_s6, %s365_s7  ;;  %p371_p12 = scmp.lt.s32.totalorder %s365_s7, %s365_s7 }
  0x1c   :  { %p372_p13 = por %p371_p12, %p370_p11 }
  0x1e   :  { %p373_p0 = pnand %p372_p13, %p366_p10 }
  0x20   :  { %376 = shalt.err (!%p373_p0)
}
  0x21   :  { %50 = dma.hbm_to_vmem [thread:$0]  %s478_s3, 512, %s45_s6, [#allocation6], %s405_s23, %s405_s23, %s406_s24  }
  0x22   :  { %397 = dma.done.wait [#allocation3], 256  }
  0x23   :  { %398 = vsyncadd [#allocation3], 4294967040 }
  0x24   :  { %399 = dma.done.wait [#allocation6], 1024  }
  0x25   :  { %400 = vsyncadd [#allocation6], 4294966272  ;;  %vm75_vm0 = vcmask 261120   ;;  %v67_v0 = vld [vmem:[#allocation5 + $0x18] sm:$0xff]  ;;  %v66_v1 = vld [vmem:[#allocation5 + $0x10] sm:$0xff]  ;;  %s408_s11 = smov [#allocation8]  }
  0x26   :  { %289 = vmatprep.subr.mxu0 %v67_v0  ;;  %v62_v2 = vld [vmem:[#allocation2] sm:$0xff]  ;;  %v65_v3 = vld [vmem:[#allocation5 + $0x8] sm:$0xff]  ;;  %v64_v4 = vld [vmem:[#allocation5] sm:$0xff]  ;;  %s258_s12 = sshll.u32 %s408_s11, 4  ;;  %s259_s12 = int_to_ptr.vmem [resolvable:$true] %s258_s12 }
  0x27   :  { %290 = vmatpush3.msra.mxu0 %v67_v0  ;;  %297 = vmatprep.mubr.msk.f32.mxu0 %vm75_vm0, %v62_v2  ;;  %v63_v5 = vld [vmem:[#allocation2 + $0x8] sm:$0xff]  ;;  %v161_v7 = vld [vmem:[#allocation7 + $0x10] sm:$0xff]  ;;  %v160_v8 = vld [vmem:[#allocation7 + $0x8] sm:$0xff]  ;;  %p382_p2 = scmp.lt.s32.totalorder %s259_s12, %s259_s12 }
  0x28   :  { %291 = vmatprep.subr.mxu0 %v66_v1  ;;  %v162_v6 = vld [vmem:[#allocation7 + $0x18] sm:$0xff]  ;;  %v159_v9 = vld [vmem:[#allocation7] sm:$0xff]  ;;  %v271_v10 = vld [vmem:[%s477_s2] ss:$0 sm:$0xff]  ;;  %s377_s2 = scalar_lea.vmem %s259_s12, 256 }
  0x29   :  { %292 = vmatpush3.msra.mxu0 %v66_v1  ;;  %300 = vmatprep.subr.mxu1 %v162_v6  ;;  %v274_v17 = vld [vmem:[%s479_s4] ss:$0 sm:$0xff]  ;;  %p378_p1 = scmp.ne.s32.totalorder %s259_s12, %s377_s2  ;;  %p383_p3 = scmp.lt.s32.totalorder %s377_s2, %s377_s2 }
  0x2a   :  { %293 = vmatprep.subr.mxu0 %v65_v3  ;;  %301 = vmatpush3.msra.mxu1 %v162_v6 }
  0x2b   :  { %294 = vmatpush3.msra.mxu0 %v65_v3  ;;  %302 = vmatprep.subr.mxu1 %v161_v7  ;;  %p384_p4 = por %p383_p3, %p382_p2 }
  0x2c   :  { %295 = vmatprep.subr.mxu0 %v64_v4  ;;  %303 = vmatpush3.msra.mxu1 %v161_v7 }
  0x2d   :  { %296 = vmatpush3.msra.mxu0 %v64_v4  ;;  %304 = vmatprep.subr.mxu1 %v160_v8  ;;  %p385_p5 = pnand %p384_p4, %p378_p1 }
  0x2e   :  { %298 = vmatmul.mubr.msk.f32.vlgmr.msra.gmra.mxu0 %vm75_vm0, %v63_v5  ;;  %305 = vmatpush3.msra.mxu1 %v160_v8 }
  0x2f   :  { %306 = vmatprep.subr.mxu1 %v159_v9 }
  0x30   :  { %307 = vmatpush3.msra.mxu1 %v159_v9 }
  0xee   :  { %v299_v11 = vpop.f32.mrf.mxu0 }
  0xef   :  { %v154_v12 = vadd.f32 %v299_v11, %v271_v10 }
  0xf0   :  { %v148_v13 = vpop.f32.mrf.mxu0 }
  0xf1   :  { %v149_v14 = vadd.f32 %v271_v10, %v148_v13  ;;  %v158_v16 = vmax.f32 %v154_v12, 0.0 }
  0xf3   :  { %v157_v15 = vmax.f32 %v149_v14, 0.0 }
  0xf5   :  { %308 = vmatprep.mubr.msk.f32.mxu1 %vm75_vm0, %v157_v15 }
  0xf6   :  { %309 = vmatmul.mubr.msk.f32.vlgmr.msra.gmra.mxu1 %vm75_vm0, %v158_v16 }
 0x1b6   :  { %v310_v18 = vpop.f32.mrf.mxu1 }
 0x1b7   :  { %v248_v19 = vadd.f32 %v310_v18, %v274_v17 }
 0x1b8   :  { %v242_v20 = vpop.f32.mrf.mxu1 }
 0x1b9   :  { %252 = vst.msk [vmem:[#allocation8 + $0x8] sm:$0xff] %vm75_vm0, %v248_v19  ;;  %v243_v21 = vadd.f32 %v274_v17, %v242_v20 }
 0x1bb   :  { %251 = vst.msk [vmem:[#allocation8] sm:$0xff] %vm75_vm0, %v243_v21 }
 0x1bc   :  { %388 = shalt.err (!%p385_p5)
}
 0x1bd   :  { %264 = dma.vmem_to_hbm [thread:$0]  %s259_s12, 256, %s480_s5, [#allocation4], %s405_s23, %s405_s23, %s406_s24  }
 0x1be   :  { %401 = dma.done.wait [#allocation4], 256  }
 0x1bf   :  { %402 = vsyncadd [#allocation4], 4294967040 }
 0x1c0   :  { %268 = vsyncpa [#allocation3], 1 }
 0x1c1   :  { %269 = vsyncpa [#allocation6], 1 }
 0x1c2   :  { %270 = vsyncpa [#allocation4], 1 }

</bundles_post_ra>
